<compile_context>
chip_gen: v6e
topology: v6e:2x2x1
jax: 0.10.0
libtpu: 0.0.40
codegen_flags: <defaults>
</compile_context>

<pallas_src>
import functools

import jax
import jax.numpy as jnp
from jax.experimental import pallas as pl
from jax.experimental.pallas import tpu as pltpu


def _conv_gap_head_kernel(
    x_ref,      # (1, H, W*CIN)        flattened image rows, bf16, VMEM
    wim_ref,    # (3*W*CIN, W*COUT)    banded conv weight (im2col RHS), bf16
    bias_ref,   # (1, W*COUT)          conv bias tiled j-major, f32
    hw_ref,     # (1, W*COUT)          classifier weight tiled j-major, f32
    hb_ref,     # (1, 1)               classifier bias, f32
    o_ref,      # (1, 1, 1)            logit for this image, f32
    xv_ref,     # (H+2, W*CIN)         vertically halo-padded staging, f32
    imc_ref,    # (H, 3*W*CIN)         im2col LHS staging, bf16
    *, H, W, CIN):
    WC = W * CIN
    x2 = x_ref[0]                                           # (H, W*CIN) bf16

    # Vertical "same" halo handled in-kernel (no wrapper jnp.pad round trip).
    # f32 staging keeps the odd-sublane-offset store in 32-bit land.
    xv_ref[0:1, :] = jnp.zeros((1, WC), jnp.float32)
    xv_ref[H + 1:H + 2, :] = jnp.zeros((1, WC), jnp.float32)
    xv_ref[1:H + 1, :] = x2.astype(jnp.float32)

    # Build the (H, 3*W*CIN) im2col LHS with three static-lane-offset slab
    # stores (one per vertical tap); lane blocks are kh-major, jin*CIN+c minor.
    for kh in range(3):
        imc_ref[:, kh * WC:(kh + 1) * WC] = (
            xv_ref[kh:kh + H, :].astype(jnp.bfloat16))

    # ONE MXU GEMM: (H, 3*W*CIN) @ (3*W*CIN, W*COUT), f32 accumulation.
    # Horizontal taps + left/right halo are encoded in the banded weight.
    y = jnp.dot(imc_ref[...], wim_ref[...],
                preferred_element_type=jnp.float32)         # (H, W*COUT) f32

    # bias + ReLU in the lane-dense j-major layout (VPU).
    y = jnp.maximum(y + bias_ref[...], 0.0)

    # Global average pool + Linear(COUT -> 1) fused:
    #   logit = mean_{i,j,o}-weighted sum = (1/(H*W)) * sum_i sum_lanes y*hw + b
    s = jnp.sum(y * hw_ref[...], axis=-1, keepdims=True)    # (H, 1) lane reduce
    logit = jnp.sum(s, axis=0, keepdims=True) * (1.0 / (H * W)) + hb_ref[...]
    o_ref[...] = logit.reshape(1, 1, 1).astype(o_ref.dtype)


def _prepare_operands(x_nchw, params):
    """Layout glue + banded-weight construction (pure JAX, tiny)."""
    conv_w, conv_b, head_w, head_b = params
    N, CIN, H, W = x_nchw.shape
    COUT = conv_w.shape[-1]
    WC, WO = W * CIN, W * COUT

    # NCHW -> lane-flattened NHWC rows, bf16 MXU operands.
    # TODO(synk): this transpose belongs in the data producer for a real
    # input pipeline; the old full-image jnp.pad round trip is removed.
    x_rows = jnp.transpose(x_nchw, (0, 2, 3, 1)).reshape(N, H, WC)
    x_rows = x_rows.astype(jnp.bfloat16)

    # Banded (Toeplitz-along-W) GEMM weight:
    #   wim[kh*W*CIN + jin*CIN + c, j*COUT + o] = conv_w[kh, jin-j+1, c, o]
    # with implicit zeros outside the 3 horizontal taps (= "same" halo).
    jin = jnp.arange(W)[:, None]
    jout = jnp.arange(W)[None, :]
    masks = jnp.stack(
        [(jin == jout + kw - 1).astype(jnp.float32) for kw in range(3)])  # (3,W,W)
    wim = jnp.einsum("kij,hkco->hicjo", masks, conv_w.astype(jnp.float32))
    wim = wim.reshape(3 * WC, WO).astype(jnp.bfloat16)

    bias_big = jnp.tile(conv_b.reshape(1, COUT).astype(jnp.float32), (1, W))
    hw_big = jnp.tile(head_w.reshape(1, COUT).astype(jnp.float32), (1, W))
    hb = head_b.reshape(1, 1).astype(jnp.float32)
    return x_rows, wim, bias_big, hw_big, hb


def model_forward(x_nchw, params):
    """Equivalent of Model.forward: returns (N, 1) logits."""
    N, CIN, H, W = x_nchw.shape
    COUT = params[0].shape[-1]
    WC, WO, K = W * CIN, W * COUT, 3 * W * CIN

    x_rows, wim, bias_big, hw_big, hb = _prepare_operands(x_nchw, params)

    kernel = functools.partial(_conv_gap_head_kernel, H=H, W=W, CIN=CIN)

    out = pl.pallas_call(
        kernel,
        out_shape=jax.ShapeDtypeStruct((N, 1, 1), jnp.float32),
        grid=(N,),
        in_specs=[
            pl.BlockSpec((1, H, WC), lambda n: (n, 0, 0)),   # image rows
            pl.BlockSpec((K, WO),    lambda n: (0, 0)),      # banded conv W
            pl.BlockSpec((1, WO),    lambda n: (0, 0)),      # conv bias (tiled)
            pl.BlockSpec((1, WO),    lambda n: (0, 0)),      # head W (tiled)
            pl.BlockSpec((1, 1),     lambda n: (0, 0)),      # head bias
        ],
        out_specs=pl.BlockSpec((1, 1, 1), lambda n: (n, 0, 0)),
        scratch_shapes=[
            pltpu.VMEM((H + 2, WC), jnp.float32),            # vertical-halo window
            pltpu.VMEM((H, K), jnp.bfloat16),                # im2col LHS staging
        ],
        compiler_params=pltpu.CompilerParams(
            dimension_semantics=("parallel",)),              # batch across TCs (v7x)
    )(x_rows, wim, bias_big, hw_big, hb)
    return out.reshape(N, 1)


def model_predict(x_nchw, params):
    """Equivalent of Model.predict: sigmoid of the logits."""
    return jax.nn.sigmoid(model_forward(x_nchw, params))


def init_params(key, cin, cout):
    """Deterministic synthetic parameters (no checkpoint load)."""
    k1, k2, _ = jax.random.split(key, 3)
    conv_w = jax.random.normal(k1, (3, 3, cin, cout), jnp.float32) * 0.1
    conv_b = jnp.linspace(-0.1, 0.1, cout, dtype=jnp.float32).reshape(1, cout)
    head_w = jax.random.normal(k2, (cout, 1), jnp.float32) * 0.1
    head_b = jnp.full((1, 1), 0.05, jnp.float32)
    return conv_w, conv_b, head_w, head_b


def _reference_forward(x_nchw, params):
    """Pure-JAX reference (mirrors the kernel's bf16-operand / f32-accum conv)."""
    conv_w, conv_b, head_w, head_b = params
    x = jnp.transpose(x_nchw, (0, 2, 3, 1))
    x = x.astype(jnp.bfloat16).astype(jnp.float32)
    w = conv_w.astype(jnp.bfloat16).astype(jnp.float32)
    y = jax.lax.conv_general_dilated(
        x, w, window_strides=(1, 1), padding="SAME",
        dimension_numbers=("NHWC", "HWIO", "NHWC"))
    y = jnp.maximum(y + conv_b.reshape(1, 1, 1, -1), 0.0)
    pooled = jnp.mean(y, axis=(1, 2))
    return pooled @ head_w + head_b


if __name__ == "__main__":
    key = jax.random.PRNGKey(0)
    kx, kp = jax.random.split(key)

    N, CIN, H, W = 2, 4, 16, 16
    COUT = 32

    x = jax.random.normal(kx, (N, CIN, H, W), jnp.float32)   # NCHW input
    params = init_params(kp, CIN, COUT)

    out = jax.block_until_ready(model_forward(x, params))
    ref = _reference_forward(x, params)
    assert out.shape == (N, 1), out.shape
    assert jnp.allclose(out, ref, rtol=5e-3, atol=5e-3), (out, ref)

    # also exercise predict()
    prob = jax.block_until_ready(model_predict(x, params))
    assert prob.shape == (N, 1)

    print("KERNEL_OK")
</pallas_src>

<mosaic_0001>
module attributes {stable_mosaic.version = 11 : i64} {
  func.func @_conv_gap_head_kernel(%arg0: i32, %arg1: memref<1x16x64xbf16, #tpu.memory_space<vmem>>, %arg2: memref<192x512xbf16, #tpu.memory_space<vmem>>, %arg3: memref<1x512xf32, #tpu.memory_space<vmem>>, %arg4: memref<1x512xf32, #tpu.memory_space<vmem>>, %arg5: memref<1x1xf32, #tpu.memory_space<vmem>>, %arg6: memref<1x1x1xf32, #tpu.memory_space<vmem>>, %arg7: memref<18x64xf32, #tpu.memory_space<vmem>>, %arg8: memref<16x192xbf16, #tpu.memory_space<vmem>>) attributes {dimension_semantics = [#tpu.dimension_semantics<parallel>], iteration_bounds = array<i64: 2>, scalar_prefetch = 0 : i64, scratch_operands = 2 : i64, tpu.core_type = #tpu.core_type<tc>, window_params = [{transform_indices = @transform_0, window_bounds = array<i64: 1, 16, 64>}, {pipeline_mode = #tpu.pipeline_mode<synchronous>, transform_indices = @transform_1, window_bounds = array<i64: 192, 512>}, {pipeline_mode = #tpu.pipeline_mode<synchronous>, transform_indices = @transform_2, window_bounds = array<i64: 1, 512>}, {pipeline_mode = #tpu.pipeline_mode<synchronous>, transform_indices = @transform_3, window_bounds = array<i64: 1, 512>}, {pipeline_mode = #tpu.pipeline_mode<synchronous>, transform_indices = @transform_4, window_bounds = array<i64: 1, 1>}, {transform_indices = @transform_5, window_bounds = array<i64: 1, 1, 1>}]} {
    %c0 = arith.constant 0 : index
    %c0_0 = arith.constant 0 : index
    %c0_1 = arith.constant 0 : index
    %0 = vector.load %arg1[%c0, %c0_0, %c0_1] : memref<1x16x64xbf16, #tpu.memory_space<vmem>>, vector<1x16x64xbf16>
    %1 = vector.shape_cast %0 : vector<1x16x64xbf16> to vector<16x64xbf16>
    %cst = arith.constant 0.000000e+00 : f32
    %2 = vector.broadcast %cst : f32 to vector<1x64xf32>
    %c0_2 = arith.constant 0 : index
    %c0_3 = arith.constant 0 : index
    %3 = vector.load %arg7[%c0_2, %c0_3] : memref<18x64xf32, #tpu.memory_space<vmem>>, vector<1x64xf32>
    tpu.vector_store %arg7[%c0_2, %c0_3], %2 {strides = array<i32>} : memref<18x64xf32, #tpu.memory_space<vmem>>, vector<1x64xf32>,
    %cst_4 = arith.constant 0.000000e+00 : f32
    %4 = vector.broadcast %cst_4 : f32 to vector<1x64xf32>
    %c17 = arith.constant 17 : index
    %c0_5 = arith.constant 0 : index
    %5 = vector.load %arg7[%c17, %c0_5] : memref<18x64xf32, #tpu.memory_space<vmem>>, vector<1x64xf32>
    tpu.vector_store %arg7[%c17, %c0_5], %4 {strides = array<i32>} : memref<18x64xf32, #tpu.memory_space<vmem>>, vector<1x64xf32>,
    %6 = arith.extf %1 : vector<16x64xbf16> to vector<16x64xf32>
    %c1 = arith.constant 1 : index
    %c0_6 = arith.constant 0 : index
    %7 = vector.load %arg7[%c1, %c0_6] : memref<18x64xf32, #tpu.memory_space<vmem>>, vector<16x64xf32>
    tpu.vector_store %arg7[%c1, %c0_6], %6 {strides = array<i32>} : memref<18x64xf32, #tpu.memory_space<vmem>>, vector<16x64xf32>,
    %c0_7 = arith.constant 0 : index
    %c0_8 = arith.constant 0 : index
    %8 = vector.load %arg7[%c0_7, %c0_8] : memref<18x64xf32, #tpu.memory_space<vmem>>, vector<16x64xf32>
    %9 = arith.truncf %8 : vector<16x64xf32> to vector<16x64xbf16>
    %c0_9 = arith.constant 0 : index
    %c0_10 = arith.constant 0 : index
    %10 = vector.load %arg8[%c0_9, %c0_10] : memref<16x192xbf16, #tpu.memory_space<vmem>>, vector<16x64xbf16>
    tpu.vector_store %arg8[%c0_9, %c0_10], %9 {strides = array<i32>} : memref<16x192xbf16, #tpu.memory_space<vmem>>, vector<16x64xbf16>,
    %c1_11 = arith.constant 1 : index
    %c0_12 = arith.constant 0 : index
    %11 = vector.load %arg7[%c1_11, %c0_12] : memref<18x64xf32, #tpu.memory_space<vmem>>, vector<16x64xf32>
    %12 = arith.truncf %11 : vector<16x64xf32> to vector<16x64xbf16>
    %c0_13 = arith.constant 0 : index
    %c64 = arith.constant 64 : index
    %13 = vector.load %arg8[%c0_13, %c64] : memref<16x192xbf16, #tpu.memory_space<vmem>>, vector<16x64xbf16>
    tpu.vector_store %arg8[%c0_13, %c64], %12 {strides = array<i32>} : memref<16x192xbf16, #tpu.memory_space<vmem>>, vector<16x64xbf16>,
    %c2 = arith.constant 2 : index
    %c0_14 = arith.constant 0 : index
    %14 = vector.load %arg7[%c2, %c0_14] : memref<18x64xf32, #tpu.memory_space<vmem>>, vector<16x64xf32>
    %15 = arith.truncf %14 : vector<16x64xf32> to vector<16x64xbf16>
    %c0_15 = arith.constant 0 : index
    %c128 = arith.constant 128 : index
    %16 = vector.load %arg8[%c0_15, %c128] : memref<16x192xbf16, #tpu.memory_space<vmem>>, vector<16x64xbf16>
    tpu.vector_store %arg8[%c0_15, %c128], %15 {strides = array<i32>} : memref<16x192xbf16, #tpu.memory_space<vmem>>, vector<16x64xbf16>,
    %c0_16 = arith.constant 0 : index
    %c0_17 = arith.constant 0 : index
    %17 = vector.load %arg8[%c0_16, %c0_17] : memref<16x192xbf16, #tpu.memory_space<vmem>>, vector<16x192xbf16>
    %c0_18 = arith.constant 0 : index
    %c0_19 = arith.constant 0 : index
    %18 = vector.load %arg2[%c0_18, %c0_19] : memref<192x512xbf16, #tpu.memory_space<vmem>>, vector<192x512xbf16>
    %cst_20 = arith.constant dense<0.000000e+00> : vector<16x512xf32>
    %19 = tpu.matmul %17, %18, %cst_20 {dimension_numbers = #tpu.dot_dimension_numbers<[1], [0], [0], [1], [0, 0, 1, 1], [], []>} : vector<16x192xbf16>, vector<192x512xbf16>, vector<16x512xf32> -> vector<16x512xf32>
    %c0_21 = arith.constant 0 : index
    %c0_22 = arith.constant 0 : index
    %20 = vector.load %arg3[%c0_21, %c0_22] : memref<1x512xf32, #tpu.memory_space<vmem>>, vector<1x512xf32>
    %21 = vector.broadcast %20 : vector<1x512xf32> to vector<16x512xf32>
    %22 = arith.addf %19, %21 : vector<16x512xf32>
    %cst_23 = arith.constant 0.000000e+00 : f32
    %23 = vector.broadcast %cst_23 : f32 to vector<16x512xf32>
    %24 = arith.maximumf %22, %23 : vector<16x512xf32>
    %c0_24 = arith.constant 0 : index
    %c0_25 = arith.constant 0 : index
    %25 = vector.load %arg4[%c0_24, %c0_25] : memref<1x512xf32, #tpu.memory_space<vmem>>, vector<1x512xf32>
    %26 = vector.broadcast %25 : vector<1x512xf32> to vector<16x512xf32>
    %27 = arith.mulf %24, %26 : vector<16x512xf32>
    %cst_26 = arith.constant dense<0.000000e+00> : vector<16xf32>
    %28 = vector.multi_reduction <add>, %27, %cst_26 [1] : vector<16x512xf32> to vector<16xf32>
    %29 = vector.shape_cast %28 : vector<16xf32> to vector<16x1xf32>
    %cst_27 = arith.constant dense<0.000000e+00> : vector<1xf32>
    %30 = vector.multi_reduction <add>, %29, %cst_27 [0] : vector<16x1xf32> to vector<1xf32>
    %31 = vector.shape_cast %30 : vector<1xf32> to vector<1x1xf32>
    %cst_28 = arith.constant 3.906250e-03 : f32
    %32 = vector.broadcast %cst_28 : f32 to vector<1x1xf32>
    %33 = arith.mulf %31, %32 : vector<1x1xf32>
    %c0_29 = arith.constant 0 : index
    %c0_30 = arith.constant 0 : index
    %34 = vector.load %arg5[%c0_29, %c0_30] : memref<1x1xf32, #tpu.memory_space<vmem>>, vector<1x1xf32>
    %35 = arith.addf %33, %34 : vector<1x1xf32>
    %36 = vector.shape_cast %35 : vector<1x1xf32> to vector<1x1x1xf32>
    %c0_31 = arith.constant 0 : index
    %c0_32 = arith.constant 0 : index
    %c0_33 = arith.constant 0 : index
    %37 = vector.load %arg6[%c0_31, %c0_32, %c0_33] : memref<1x1x1xf32, #tpu.memory_space<vmem>>, vector<1x1x1xf32>
    tpu.vector_store %arg6[%c0_31, %c0_32, %c0_33], %36 {strides = array<i32>} : memref<1x1x1xf32, #tpu.memory_space<vmem>>, vector<1x1x1xf32>,
    return
  }
  func.func @transform_0(%arg0: i32) -> (i32, i32, i32) {
    %c0_i32 = arith.constant 0 : i32
    %c0_i32_0 = arith.constant 0 : i32
    %c0_i32_1 = arith.constant 0 : i32
    return %arg0, %c0_i32, %c0_i32_0 : i32, i32, i32
  }
  func.func @transform_1(%arg0: i32) -> (i32, i32) {
    %c0_i32 = arith.constant 0 : i32
    %c0_i32_0 = arith.constant 0 : i32
    %c0_i32_1 = arith.constant 0 : i32
    return %c0_i32, %c0_i32_0 : i32, i32
  }
  func.func @transform_2(%arg0: i32) -> (i32, i32) {
    %c0_i32 = arith.constant 0 : i32
    %c0_i32_0 = arith.constant 0 : i32
    %c0_i32_1 = arith.constant 0 : i32
    return %c0_i32, %c0_i32_0 : i32, i32
  }
  func.func @transform_3(%arg0: i32) -> (i32, i32) {
    %c0_i32 = arith.constant 0 : i32
    %c0_i32_0 = arith.constant 0 : i32
    %c0_i32_1 = arith.constant 0 : i32
    return %c0_i32, %c0_i32_0 : i32, i32
  }
  func.func @transform_4(%arg0: i32) -> (i32, i32) {
    %c0_i32 = arith.constant 0 : i32
    %c0_i32_0 = arith.constant 0 : i32
    %c0_i32_1 = arith.constant 0 : i32
    return %c0_i32, %c0_i32_0 : i32, i32
  }
  func.func @transform_5(%arg0: i32) -> (i32, i32, i32) {
    %c0_i32 = arith.constant 0 : i32
    %c0_i32_0 = arith.constant 0 : i32
    %c0_i32_1 = arith.constant 0 : i32
    return %arg0, %c0_i32, %c0_i32_0 : i32, i32, i32
  }
}

</mosaic_0001>

<bundles_post_ra>
// kernel: tpu_custom_call.1
= control target key start
LH: loop header
LB: loop body
LE: loop exit
PB: predicated region body
PF: predicated region fallthrough
CT: control target
= control target key end

     0   :  { %s1401_s0 = inlined_call_operand.hbm [shape: bf16[2,16,64], index: 0, kind: input, shape index: {}]   ;;  %s1402_s1 = inlined_call_operand.hbm [shape: bf16[192,512], index: 1, kind: input, shape index: {}]   ;;  %s1403_s2 = inlined_call_operand.vmem [shape: f32[1,512], index: 2, kind: input, shape index: {}]   ;;  %s1404_s3 = inlined_call_operand.hbm [shape: f32[1,512], index: 3, kind: input, shape index: {}]   ;;  %s1405_s4 = inlined_call_operand.<no memory space> [shape: f32[1,1], index: 4, kind: input, shape index: {}]   ;;  %s1406_s5 = inlined_call_operand.vmem [shape: f32[2,1,1], index: 5, kind: output, shape index: {}]  }
   0x1   :  { %v10_v0 = vstv %s1405_s4 }
   0x2   :  { %11 = vst [vmem:[#allocation4] sm:$0x1] %v10_v0 }
   0x3   :  { %12 = vsyncpa [#allocation6], 0 }
   0x4   :  { %14 = vsyncpa [#allocation6 + $0x1], 0 }
   0x5   :  { %15 = vsyncpa [#allocation8], 0  ;;  %s1253_s20 = smov 0   ;;  %s1255_s21 = smov 0  }
   0x6   :  { %s1257_s22 = smov 0   ;;  %s1259_s23 = smov 0  }
   0x7 LB: > { %s1272_s4 = sadd.s32 4294967295, %s1209_s23   ;;  %p41_p0 = scmp.ne.s32.totalorder %s1201_s21, %s1197_s20  ;;  %s1209_s23 = sphi %s1259_s23, %s1421_s23   ;;  %s1205_s22 = sphi %s1257_s22, %s1420_s22   ;;  %s1201_s21 = sphi %s1255_s21, %s1419_s21   ;;  %s1197_s20 = sphi %s1253_s20, %s1418_s20  }
   0x8   : > { %p1407_p1 = scmp.eq.s32.totalorder %s1272_s4, 0  ;;  %p872_p2 = scmp.ge.s32.totalorder %s1209_s23, 1 }
   0x9   : > { %p162_p3 = scmp.lt.s32.totalorder %s1209_s23, 3  ;;  %s1211_s26 = smov [#allocation7]  }
   0xa   : > { %p1280_p4 = por %p1407_p1, %p41_p0  ;;  %s174_s27 = sshll.u32 %s1211_s26, 4  ;;  %s175_s27 = int_to_ptr.vmem [resolvable:$true] %s174_s27 }
   0xb   : > { %p1284_p5 = pnand %p872_p2, %p162_p3  ;;  %s1212_s29 = smov [#allocation9]  }
   0xc   : > { %s1410_s24 = scalar_select %p1280_p4, 1, 0 }
   0xd   : > { %s1411_s25 = scalar_select %p1284_p5, 1, 0 }
   0xe   : > { %p964_p6 = pneg %p1284_p5  ;;  %s191_s30 = sshll.u32 %s1212_s29, 4  ;;  %s192_s30 = int_to_ptr.vmem [resolvable:$true] %s191_s30 }
   0xf   : > { %s1102_s6 = scalar_lea.vmem %s175_s27, 6144  ;;  %p1110_p12 = scmp.lt.s32.totalorder %s175_s27, %s175_s27 }
  0x10   : > { %p1292_p7 = pnand %p964_p6, %p1407_p1  ;;  %p1103_p9 = scmp.ne.s32.totalorder %s175_s27, %s1102_s6 }
  0x11   : > { %p1111_p13 = scmp.lt.s32.totalorder %s1102_s6, %s1102_s6 }
  0x12   : > { %p1093_p8 = pneg %p1292_p7 }
  0x13   : > { %p1112_p0 = por %p1111_p13, %p1110_p12 }
  0x14   : > { %p1105_p10 = pnand %p1103_p9, %p1093_p8 }
  0x16   : > { %p1106_p11 = pneg %p1105_p10 }
  0x18   : > { %p1113_p2 = pnand %p1112_p0, %p1106_p11 }
  0x1a   : > { %1116 = shalt.err (!%p1113_p2)
}
  0x1b   : > { %s1213_s7 = smov 256   ;;  %s1214_s8 = smov 16  }
  0x1c   : > { %967 = dma.hbm_to_vmem [thread:$0]  (!%p1292_p7), %s1402_s1, 6144, %s175_s27, [#allocation8], %s1213_s7, %s1213_s7, %s1214_s8  }
  0x1d   : > { %s1128_s11 = scalar_lea.vmem %s192_s30, 64  ;;  %p1136_p10 = scmp.lt.s32.totalorder %s192_s30, %s192_s30 }
  0x1e   : > { %p1129_p3 = scmp.ne.s32.totalorder %s192_s30, %s1128_s11  ;;  %p1137_p1 = scmp.lt.s32.totalorder %s1128_s11, %s1128_s11 }
  0x20   : > { %p1131_p6 = pnand %p1129_p3, %p1093_p8  ;;  %p1138_p12 = por %p1137_p1, %p1136_p10 }
  0x22   : > { %p1132_p9 = pneg %p1131_p6 }
  0x24   : > { %p1139_p11 = pnand %p1138_p12, %p1132_p9 }
  0x26   : > { %1142 = shalt.err (!%p1139_p11)
}
  0x27   : > { %970 = dma.hbm_to_vmem [thread:$0]  (!%p1292_p7), %s1404_s3, 64, %s192_s30, [#allocation8]  }
  0x28   : > { %s1315_s14 = sadd.s32 1, %s1209_s23   ;;  %s28_s15 = sadd.s32 1, %s1205_s22 }
  0x29   : > { %s25_s16 = ssub.s32 %s1209_s23, %s1315_s14  ;;  %p35_p1 = scmp.ne.s32.totalorder %s1205_s22, %s1201_s21 }
  0x2a   : > { %p26_p8 = scmp.eq.s32.totalorder %s25_s16, 0  ;;  %p36_p13 = scmp.eq.s32.totalorder %s1209_s23, 0 }
  0x2b   : > { %p977_p0 = scmp.lt.s32.totalorder %s1209_s23, 2  ;;  %s205_s17 = sand.u32 1, %s1205_s22  }
  0x2c   : > { %s1326_s18 = scalar_select %p26_p8, %s1205_s22, %s28_s15  }
  0x2d   : > { %p37_p2 = por %p36_p13, %p35_p1  ;;  %s876_s19 = sshll.u32 %s205_s17, 3 }
  0x2e   : > { %s943_s20 = sshll.u32 %s1209_s23, 7  ;;  %s209_s29 = scalar_lea.vmem [#allocation5], %s876_s19 }
  0x2f   : > { %s1332_s28 = scalar_lea.hbm %s1401_s0, %s943_s20  ;;  %s216_s30 = sshll.u32 %s209_s29, 4  ;;  %s1338_s30 = int_to_ptr.vmem [resolvable:$true] %s216_s30 }
  0x30   : > { %p1334_p7 = pnand %p977_p0, %p37_p2  ;;  %s1340_s7 = scalar_lea.sflag [#allocation6], %s205_s17 }
  0x31   : > { %s1143_s23 = scalar_lea.hbm %s1332_s28, 128  ;;  %s1148_s10 = scalar_lea.hbm %s1401_s0, 256 }
  0x32   : > { %p1144_p3 = scmp.ne.s32.totalorder %s1332_s28, %s1143_s23  ;;  %p1145_p6 = pneg %p1334_p7 }
  0x33   : > { %p1149_p12 = scmp.lt.s32.totalorder %s1332_s28, %s1401_s0  ;;  %p1150_p11 = scmp.lt.s32.totalorder %s1148_s10, %s1143_s23 }
  0x34   : > { %p1146_p9 = pnand %p1145_p6, %p1144_p3 }
  0x35   : > { %p1151_p1 = por %p1150_p11, %p1149_p12 }
  0x36   : > { %p1147_p10 = pneg %p1146_p9 }
  0x38   : > { %p1152_p8 = pnand %p1151_p1, %p1147_p10 }
  0x3a   : > { %1155 = shalt.err (!%p1152_p8)
}
  0x3b   : > { %s1156_s13 = scalar_lea.vmem %s1338_s30, 128  ;;  %s1215_s15 = smov [#allocation5]  }
  0x3c   : > { %p1157_p13 = scmp.ne.s32.totalorder %s1338_s30, %s1156_s13  ;;  %s1161_s16 = sshll.u32 %s1215_s15, 4  ;;  %s1162_s16 = int_to_ptr.vmem [resolvable:$false] %s1161_s16 }
  0x3d   : > { %s1163_s17 = scalar_lea.vmem %s1162_s16, 256  ;;  %p1164_p3 = scmp.lt.s32.totalorder %s1338_s30, %s1162_s16 }
  0x3e   : > { %p1159_p0 = pnand %p1157_p13, %p1145_p6  ;;  %p1165_p9 = scmp.lt.s32.totalorder %s1163_s17, %s1156_s13 }
  0x40   : > { %p1160_p2 = pneg %p1159_p0  ;;  %p1166_p4 = por %p1165_p9, %p1164_p3 }
  0x42   : > { %p1167_p5 = pnand %p1166_p4, %p1160_p2 }
  0x44   : > { %1170 = shalt.err (!%p1167_p5)
}
  0x45   : > { %s1216_s19 = smov 64   ;;  %s1217_s20 = smov 4  }
  0x46   : > { %974 = dma.hbm_to_vmem [thread:$0]  (!%p1334_p7), %s1332_s28, 128, %s1338_s30, %s1340_s7, %s1216_s19, %s1216_s19, %s1217_s20  }
  0x47   : > { %p1414_p6 = scmp.ne.s32.totalorder %s1411_s25, 0 }
  0x48   : > { %s230_s26 = sand.u32 (!%p1414_p6), 1, %s1201_s21   ;;  %p1415_p10 = scmp.ne.s32.totalorder (!%p1414_p6), %s1410_s24, 0 }
  0x49   : > { %228 = sbr.rel (%p1414_p6) target bundleno = 590 (0x24e), region = 40  ;;  %s880_s27 = sshll.u32 (!%p1414_p6), %s230_s26, 3 }
  0x4a   : > { %s231_s29 = scalar_lea.sflag (!%p1414_p6), [#allocation6], %s230_s26  ;;  %s234_s23 = scalar_lea.vmem (!%p1414_p6), [#allocation5], %s880_s27 }
  0x4e   : > { %1188 = dma.done.wait (%p1415_p10), %s231_s29, 128  }
  0x4f   : > { %1190 = vsyncadd (%p1415_p10), %s231_s29, 4294967168  ;;  %p1416_p4 = scmp.eq.s32.totalorder %s1272_s4, 0 }
  0x51   : > { %1192 = dma.done.wait (%p1416_p4), [#allocation8], 6208   ;;  %p1417_p5 = pmov %p1416_p4 }
  0x52   : > { %vm273_vm0 = vcmask 516096   ;;  %v1218_v1 = vmov 0.0   ;;  %v951_v2 = vld [vmem:[%s234_s23] sm:$0xff]   ;;  %vm278_vm1 = vcmask 523264   ;;  %s1219_s24 = smov 64   ;;  %vm291_vm2 = vcmask 519168  }
  0x53   : > { %1194 = vsyncadd (%p1417_p5), [#allocation8], 4294961088  ;;  %274 = vst.msk [vmem:[#allocation2] sm:$0x1] %vm273_vm0, %v1218_v1  ;;  %v952_v3 = vunpack.c.l.bf16 %v951_v2  ;;  %v953_v4 = vunpack.c.h.bf16 %v951_v2  ;;  %v1020_v5 = vld [vmem:[#allocation7 + $0xe4] ss:$16 sps:$4 sm:$0xff]  }
  0x54   : > { %275 = vst.msk [vmem:[#allocation2 + $0x11] sm:$0x1] %vm273_vm0, %v1218_v1  ;;  %v1022_v6 = vld [vmem:[#allocation7 + $0xec] ss:$16 sps:$4 sm:$0xff]   ;;  %v1024_v7 = vld [vmem:[#allocation7 + $0xe0] ss:$16 sps:$4 sm:$0xff]   ;;  %647 = vmatprep.subr.bf16.mxu0 %v1020_v5 }
  0x55   : > { %v1025_v8 = vld [vmem:[#allocation7 + $0xe8] ss:$16 sps:$4 sm:$0xff]   ;;  %279 = vst.msk [vmem:[#allocation2 + $0x1] sm:$0xff] %vm278_vm1, %v952_v3  ;;  %280 = vst.msk [vmem:[#allocation2 + $0x9] sm:$0xff] %vm278_vm1, %v953_v4  ;;  %v1026_v9 = vld [vmem:[#allocation7 + $0xc4] ss:$16 sps:$4 sm:$0xff]   ;;  %690 = vmatprep.subr.bf16.mxu1 %v1022_v6  ;;  %648 = vmatpush1.bf16.msra.mxu0 %v1024_v7 }
  0x56   : > { %v1028_v10 = vld [vmem:[#allocation7 + $0xcc] ss:$16 sps:$4 sm:$0xff]   ;;  %691 = vmatpush1.bf16.msra.mxu1 %v1025_v8  ;;  %649 = vmatprep.subr.bf16.mxu0 %v1026_v9  ;;  %v1030_v11 = vld [vmem:[#allocation7 + $0xc0] ss:$16 sps:$4 sm:$0xff]   ;;  %v1031_v12 = vld [vmem:[#allocation7 + $0xc8] ss:$16 sps:$4 sm:$0xff]  }
  0x57   : > { %692 = vmatprep.subr.bf16.mxu1 %v1028_v10  ;;  %v1032_v13 = vld [vmem:[#allocation7 + $0xa4] ss:$16 sps:$4 sm:$0xff]   ;;  %v1034_v14 = vld [vmem:[#allocation7 + $0xac] ss:$16 sps:$4 sm:$0xff]   ;;  %v1036_v15 = vld [vmem:[#allocation7 + $0xa0] ss:$16 sps:$4 sm:$0xff]  }
  0x58   : > { %v1037_v16 = vld [vmem:[#allocation7 + $0xa8] ss:$16 sps:$4 sm:$0xff]   ;;  %v1038_v17 = vld [vmem:[#allocation7 + $0x84] ss:$16 sps:$4 sm:$0xff]   ;;  %v1040_v20 = vld [vmem:[#allocation7 + $0x8c] ss:$16 sps:$4 sm:$0xff]  }
  0x59   : > { %650 = vmatpush1.bf16.msra.mxu0 %v1030_v11  ;;  %v1042_v22 = vld [vmem:[#allocation7 + $0x80] ss:$16 sps:$4 sm:$0xff]   ;;  %v1043_v24 = vld [vmem:[#allocation7 + $0x88] ss:$16 sps:$4 sm:$0xff]   ;;  %v1044_v25 = vld [vmem:[#allocation7 + $0x64] ss:$16 sps:$4 sm:$0xff]  }
  0x5a   : > { %693 = vmatpush1.bf16.msra.mxu1 %v1031_v12  ;;  %651 = vmatprep.subr.bf16.mxu0 %v1032_v13  ;;  %v1046_v26 = vld [vmem:[#allocation7 + $0x6c] ss:$16 sps:$4 sm:$0xff]   ;;  %v1048_v27 = vld [vmem:[#allocation7 + $0x60] ss:$16 sps:$4 sm:$0xff]   ;;  %v1049_v28 = vld [vmem:[#allocation7 + $0x68] ss:$16 sps:$4 sm:$0xff]   ;;  %v375_v13 = vlaneseq }
  0x5b   : > { %694 = vmatprep.subr.bf16.mxu1 %v1034_v14  ;;  %v1050_v29 = vld [vmem:[#allocation7 + $0x44] ss:$16 sps:$4 sm:$0xff]   ;;  %v1052_v30 = vld [vmem:[#allocation7 + $0x4c] ss:$16 sps:$4 sm:$0xff]   ;;  %v1054_v31 = vld [vmem:[#allocation7 + $0x40] ss:$16 sps:$4 sm:$0xff]  }
  0x5c   : > { %v294_v18 = vld [vmem:[#allocation2 + $0x1] sm:$0xff]  ;;  %v295_v19 = vld [vmem:[#allocation2 + $0x9] sm:$0xff]  ;;  %v369_v47 = vld [vmem:[#allocation7 + $0x160] sm:$0xff]  ;;  %vm308_vm3 = vcmask 1043968   ;;  %v376_v14 = vshrl.u32 %v375_v13, 7  ;;  %p267_p7 = scmp.lt.s32.totalorder %s1272_s4, 1 }
  0x5d   : > { %v946_v21 = vpack.c.bf16 %v294_v18, %v294_v18  ;;  %652 = vmatpush1.bf16.msra.mxu0 %v1036_v15  ;;  %v947_v23 = vpack.c.bf16 %v295_v19, %v295_v19  ;;  %v1055_v32 = vld [vmem:[#allocation7 + $0x48] ss:$16 sps:$4 sm:$0xff]   ;;  %v1056_v33 = vld [vmem:[#allocation7 + $0x24] ss:$16 sps:$4 sm:$0xff]   ;;  %v1058_v34 = vld [vmem:[#allocation7 + $0x2c] ss:$16 sps:$4 sm:$0xff]  }
  0x5e   : > { %695 = vmatpush1.bf16.msra.mxu1 %v1037_v16  ;;  %653 = vmatprep.subr.bf16.mxu0 %v1038_v17  ;;  %v1060_v35 = vld [vmem:[#allocation7 + $0x20] ss:$16 sps:$4 sm:$0xff]   ;;  %v1061_v38 = vld [vmem:[#allocation7 + $0x28] ss:$16 sps:$4 sm:$0xff]   ;;  %v1062_v39 = vld [vmem:[#allocation7 + $0x4] ss:$16 sps:$4 sm:$0xff]  }
  0x5f   : > { %302 = vrot.lane.b32.xlu0 %v946_v21, %s1219_s24  ;;  %696 = vmatprep.subr.bf16.mxu1 %v1040_v20  ;;  %v311_v36 = vld [vmem:[#allocation2 + $0x2] sm:$0xff]  ;;  %v312_v37 = vld [vmem:[#allocation2 + $0xa] sm:$0xff]  ;;  %v365_v57 = vld [vmem:[#allocation7 + $0x140] sm:$0xff]  ;;  %v377_v15 = vsub.s32 0, %v376_v14  ;;  %v385_v16 = vsub.s32 2, %v376_v14  ;;  %v381_v18 = vsub.s32 1, %v376_v14 }
  0x60   : > { %v948_v40 = vpack.c.bf16 %v311_v36, %v311_v36  ;;  %v949_v41 = vpack.c.bf16 %v312_v37, %v312_v37  ;;  %v281_v42 = vld [vmem:[#allocation2] sm:$0xff]  ;;  %v1066_v44 = vld [vmem:[#allocation7] ss:$16 sps:$4 sm:$0xff]   ;;  %v372_v53 = vld [vmem:[#allocation7 + $0x178] sm:$0xff]  ;;  %v389_v19 = vsub.s32 3, %v376_v14  ;;  %s1423_s4 = smov (!%p267_p7, %s1272_s4), 1 }
  0x61   : > { %654 = vmatpush1.bf16.msra.mxu0 %v1042_v22  ;;  %v1064_v43 = vld [vmem:[#allocation7 + $0xc] ss:$16 sps:$4 sm:$0xff]   ;;  %v944_v45 = vpack.c.bf16 %v281_v42, %v281_v42  ;;  %v1067_v46 = vld [vmem:[#allocation7 + $0x8] ss:$16 sps:$4 sm:$0xff]   ;;  %v371_v48 = vld [vmem:[#allocation7 + $0x170] sm:$0xff]  ;;  %s269_s7 = scalar_lea.vmem %s1406_s5, %s1423_s4  ;;  %vm791_vm4 = vcmask 0  }
  0x62   : > { %697 = vmatpush1.bf16.msra.mxu1 %v1043_v24  ;;  %655 = vmatprep.subr.bf16.mxu0 %v1044_v25  ;;  %321 = vst.msk [vmem:[#allocation3 + $0x4] sm:$0xf] %vm291_vm2, %v948_v40  ;;  %322 = vst.msk [vmem:[#allocation3 + $0xc] sm:$0xf] %vm291_vm2, %v949_v41  ;;  %v282_v49 = vld [vmem:[#allocation2 + $0x8] sm:$0xff]  ;;  %v935_v55 = vcombine.low %v369_v47, %v371_v48  ;;  %v368_v61 = vld [vmem:[#allocation7 + $0x158] sm:$0xff] }
  0x63   : > { %304 = vrot.lane.b32.xlu0 %v947_v23, %s1219_s24  ;;  %698 = vmatprep.subr.bf16.mxu1 %v1046_v26  ;;  %v1068_v50 = vld [vmem:[#allocation7 + $0x164] ss:$16 sps:$4 sm:$0xff]   ;;  %292 = vst.msk [vmem:[#allocation3] sm:$0xf] %vm291_vm2, %v944_v45  ;;  %v945_v51 = vpack.c.bf16 %v282_v49, %v282_v49  ;;  %v370_v52 = vld [vmem:[#allocation7 + $0x168] sm:$0xff] }
  0x64   : > { %v1070_v54 = vld [vmem:[#allocation7 + $0x16c] ss:$16 sps:$4 sm:$0xff]   ;;  %v937_v56 = vcombine.low %v370_v52, %v372_v53  ;;  %v367_v58 = vld [vmem:[#allocation7 + $0x150] sm:$0xff]  ;;  %v1081_v4 = vld [vmem:[#allocation7 + $0x128] ss:$16 sps:$4 sm:$0xff]  }
  0x65   : > { %656 = vmatpush1.bf16.msra.mxu0 %v1048_v27  ;;  %293 = vst.msk [vmem:[#allocation3 + $0x8] sm:$0xf] %vm291_vm2, %v945_v51  ;;  %v1072_v59 = vld [vmem:[#allocation7 + $0x144] ss:$16 sps:$4 sm:$0xff]   ;;  %v366_v60 = vld [vmem:[#allocation7 + $0x148] sm:$0xff]  ;;  %v931_v63 = vcombine.low %v365_v57, %v367_v58 }
  0x66   : > { %699 = vmatpush1.bf16.msra.mxu1 %v1049_v28  ;;  %657 = vmatprep.subr.bf16.mxu0 %v1050_v29  ;;  %v1074_v62 = vld [vmem:[#allocation7 + $0x14c] ss:$16 sps:$4 sm:$0xff]   ;;  %v933_v0 = vcombine.low %v366_v60, %v368_v61  ;;  %v1076_v1 = vld [vmem:[#allocation7 + $0x124] ss:$16 sps:$4 sm:$0xff]   ;;  %v1080_v3 = vld [vmem:[#allocation7 + $0x120] ss:$16 sps:$4 sm:$0xff]  }
  0x67   : > { %700 = vmatprep.subr.bf16.mxu1 %v1052_v30  ;;  %v1078_v2 = vld [vmem:[#allocation7 + $0x12c] ss:$16 sps:$4 sm:$0xff]   ;;  %v1082_v5 = vld [vmem:[#allocation7 + $0x104] ss:$16 sps:$4 sm:$0xff]   ;;  %v1086_v7 = vld [vmem:[#allocation7 + $0x100] ss:$16 sps:$4 sm:$0xff]  }
  0x68   : > { %v1084_v6 = vld [vmem:[#allocation7 + $0x10c] ss:$16 sps:$4 sm:$0xff]   ;;  %v1087_v8 = vld [vmem:[#allocation7 + $0x108] ss:$16 sps:$4 sm:$0xff]   ;;  %v741_v22 = vld [vmem:[#allocation9] sm:$0xf] }
  0x69   : > { %658 = vmatpush1.bf16.msra.mxu0 %v1054_v31  ;;  %v1090_v12 = vld [vmem:[#allocation3 + $0x4] ss:$8 sps:$4 sm:$0xff]   ;;  %v373_v17 = vld [vmem:[%s1403_s2] sm:$0xf]  ;;  %v746_v29 = vrot.slane %v741_v22, %v377_v15 }
  0x6a   : > { %701 = vmatpush1.bf16.msra.mxu1 %v1055_v32  ;;  %659 = vmatprep.subr.bf16.mxu0 %v1056_v33  ;;  %v378_v20 = vrot.slane %v373_v17, %v377_v15  ;;  %v386_v21 = vrot.slane %v373_v17, %v385_v16  ;;  %v382_v23 = vrot.slane %v373_v17, %v381_v18 }
  0x6b   : > { %702 = vmatprep.subr.bf16.mxu1 %v1058_v34  ;;  %939 = vmatprep.mubr.msk.bf16.mxu0 %vm278_vm1, %v1090_v12  ;;  %v390_v24 = vrot.slane %v373_v17, %v389_v19  ;;  %v750_v34 = vrot.slane %v741_v22, %v381_v18 }
  0x6c   : > { %940 = vmatprep.mubr.msk.bf16.mxu1 %vm278_vm1, %v1090_v12  ;;  %v789_v12 = vld [vmem:[#allocation4] sm:$0x1] }
  0x6d   : > { %660 = vmatpush1.bf16.msra.mxu0 %v1060_v35 }
  0x6e   : > { %703 = vmatpush1.bf16.msra.mxu1 %v1061_v38  ;;  %661 = vmatprep.subr.bf16.mxu0 %v1062_v39  ;;  %v754_v39 = vrot.slane %v741_v22, %v385_v16 }
  0x6f   : > { %704 = vmatprep.subr.bf16.mxu1 %v1064_v43 }
  0x71   : > { %662 = vmatpush1.bf16.msra.mxu0 %v1066_v44 }
  0x72   : > { %705 = vmatpush1.bf16.msra.mxu1 %v1067_v46  ;;  %671 = vmatprep.subr.bf16.mxu0 %v1068_v50  ;;  %v758_v46 = vrot.slane %v741_v22, %v389_v19 }
  0x73   : > { %714 = vmatprep.subr.bf16.mxu1 %v1070_v54 }
  0x75   : > { %672 = vmatpush2.bf16.msra.mxu0 %v935_v55 }
  0x76   : > { %715 = vmatpush2.bf16.msra.mxu1 %v937_v56  ;;  %673 = vmatprep.subr.bf16.mxu0 %v1072_v59 }
  0x77   : > { %716 = vmatprep.subr.bf16.mxu1 %v1074_v62 }
  0x79   : > { %674 = vmatpush2.bf16.msra.mxu0 %v931_v63 }
  0x7a   : > { %717 = vmatpush2.bf16.msra.mxu1 %v933_v0  ;;  %675 = vmatprep.subr.bf16.mxu0 %v1076_v1 }
  0x7b   : > { %718 = vmatprep.subr.bf16.mxu1 %v1078_v2 }
  0x7d   : > { %676 = vmatpush2.bf16.msra.mxu0 %v1080_v3 }
  0x7e   : > { %719 = vmatpush2.bf16.msra.mxu1 %v1081_v4  ;;  %677 = vmatprep.subr.bf16.mxu0 %v1082_v5 }
  0x7f   : > { %720 = vmatprep.subr.bf16.mxu1 %v1084_v6 }
  0x81   : > { %678 = vmatpush2.bf16.msra.mxu0 %v1086_v7 }
  0x82   : > { %721 = vmatpush2.bf16.msra.mxu1 %v1087_v8 }
  0xd1   : > { %v303_v9 = vpop.permute.xlu0 %302 }
  0xd2   : > { %309 = vst.msk [vmem:[#allocation3] sm:$0xf] %vm308_vm3, %v303_v9 }
  0xd5   : > { %v305_v10 = vpop.permute.xlu0 %304 }
  0xd6   : > { %310 = vst.msk [vmem:[#allocation3 + $0x8] sm:$0xf] %vm308_vm3, %v305_v10 }
  0xdd   : > { %v1088_v11 = vld [vmem:[#allocation3] ss:$8 sps:$4 sm:$0xff]  }
  0xde   : > { %680 = vmatmul.mubr.bf16.vlgmr.msra.gmra.mxu0 %v1088_v11  ;;  %723 = vmatmul.mubr.bf16.vlgmr.msra.gmra.mxu1 %v1088_v11 }
 0x19e   : > { %v681_v25 = vpop.f32.mrf.mxu0  ;;  %v724_v26 = vpop.f32.mrf.mxu1 }
 0x19f   : > { %v682_v27 = vadd.f32 %v681_v25, %v378_v20  ;;  %v725_v28 = vadd.f32 %v724_v26, %v386_v21 }
 0x1a0   : > { %v683_v30 = vpop.f32.mrf.mxu0  ;;  %v726_v31 = vpop.f32.mrf.mxu1 }
 0x1a1   : > { %v733_v32 = vmax.f32 %v682_v27, 0.0  ;;  %v684_v33 = vadd.f32 %v683_v30, %v382_v23  ;;  %v727_v35 = vadd.f32 %v726_v31, %v390_v24  ;;  %v735_v38 = vmax.f32 %v725_v28, 0.0 }
 0x1a2   : > { %v685_v36 = vpop.f32.mrf.mxu0  ;;  %v728_v37 = vpop.f32.mrf.mxu1 }
 0x1a3   : > { %v734_v40 = vmax.f32 %v684_v33, 0.0  ;;  %v736_v41 = vmax.f32 %v727_v35, 0.0  ;;  %v686_v42 = vadd.f32 %v685_v36, %v378_v20  ;;  %v729_v43 = vadd.f32 %v728_v37, %v386_v21 }
 0x1a4   : > { %v687_v44 = vpop.f32.mrf.mxu0  ;;  %v730_v45 = vpop.f32.mrf.mxu1  ;;  %v763_v47 = vmul.f32 %v746_v29, %v733_v32  ;;  %v765_v52 = vmul.f32 %v754_v39, %v735_v38 }
 0x1a5   : > { %v764_v48 = vmul.f32 %v750_v34, %v734_v40  ;;  %v688_v49 = vadd.f32 %v687_v44, %v382_v23  ;;  %v731_v50 = vadd.f32 %v730_v45, %v390_v24  ;;  %v737_v51 = vmax.f32 %v686_v42, 0.0 }
 0x1a6   : > { %v739_v53 = vmax.f32 %v729_v43, 0.0  ;;  %v766_v56 = vmul.f32 %v758_v46, %v736_v41 }
 0x1a7   : > { %v738_v54 = vmax.f32 %v688_v49, 0.0  ;;  %v771_v55 = vadd.f32 %v764_v48, %v763_v47  ;;  %v767_v57 = vmul.f32 %v746_v29, %v737_v51  ;;  %v740_v59 = vmax.f32 %v731_v50, 0.0 }
 0x1a8   : > { %v769_v61 = vmul.f32 %v754_v39, %v739_v53 }
 0x1a9   : > { %v768_v58 = vmul.f32 %v750_v34, %v738_v54  ;;  %v772_v60 = vadd.f32 %v771_v55, %v765_v52  ;;  %v770_v0 = vmul.f32 %v758_v46, %v740_v59 }
 0x1ab   : > { %v776_v62 = vadd.f32 %v768_v58, %v767_v57  ;;  %v773_v63 = vadd.f32 %v772_v60, %v766_v56 }
 0x1ad   : > { %774 = vadd.xlane.f32.xlu1 %v773_v63  ;;  %v777_v1 = vadd.f32 %v776_v62, %v769_v61 }
 0x1af   : > { %v778_v2 = vadd.f32 %v777_v1, %v770_v0 }
 0x1b1   : > { %779 = vadd.xlane.f32.xlu1 %v778_v2 }
 0x236   : > { %v775_v3 = vpop.xlane.xlu1 %774 }
 0x23a   : > { %v780_v4 = vpop.xlane.xlu1 %779 }
 0x23b   : > { %v781_v5 = vadd.f32 %v780_v4, %v775_v3 }
 0x23d   : > { %v782_v6 = vrot.slane %v781_v5, 4 }
 0x23f   : > { %v783_v7 = vadd.f32 %v782_v6, %v781_v5 }
 0x241   : > { %v784_v8 = vrot.slane %v783_v7, 2 }
 0x243   : > { %v785_v9 = vadd.f32 %v784_v8, %v783_v7 }
 0x245   : > { %v786_v10 = vrot.slane %v785_v9, 1 }
 0x247   : > { %v787_v11 = vadd.f32 %v786_v10, %v785_v9 }
 0x249   : > { %v788_v13 = vmul.f32 0.00390625, %v787_v11 }
 0x24b   : > { %v790_v14 = vadd.f32 %v789_v12, %v788_v13 }
 0x24d   : > { %792 = vst.msk [vmem:[%s269_s7] sm:$0x1] %vm791_vm4, %v790_v14 }
 0x24e PF: > { %p18_p12 = scmp.ge.s32.totalorder %s1315_s14, 4   ;;  %s1418_s20 = smov %s1201_s21 }
 0x24f   : > { %s1419_s21 = smov %s1205_s22  ;;  %s1420_s22 = smov %s1326_s18 }
 0x250   : > { %s1421_s23 = smov %s1315_s14  ;;  %20 = sbr.rel (!%p18_p12) target bundleno = 7 (0x7), region = 88 }
 0x255   :  { %810 = vsyncpa [#allocation6], 1 }
 0x256   :  { %812 = vsyncpa [#allocation6 + $0x1], 1 }
 0x257   :  { %813 = vsyncpa [#allocation8], 1 }

</bundles_post_ra>
